<compile_context>
chip_gen: v6e
topology: v6e:2x2x1
jax: 0.10.0
libtpu: 0.0.40
codegen_flags: <defaults>
</compile_context>

<pallas_src>
import functools

import jax
import jax.numpy as jnp
from jax.experimental import pallas as pl
from jax.experimental.pallas import tpu as pltpu


def _round_up(v, m):
    return (v + m - 1) // m * m


def _lora_kernel(x_ref, a_ref, b_ref, o_ref, *, scale):
    # x_ref : (tm, dim)     pipelined input-row tile
    # a_ref : (dim, r)      full LoRA A, resident in VMEM (not double-buffered)
    # b_ref : (r, tn)       LoRA B column tile
    # o_ref : (tm, tn)      lane-dense output tile (tn multiple of 128)
    xa = jnp.dot(x_ref[...], a_ref[...], preferred_element_type=jnp.float32)
    # Apply the LoRA scale on the small (tm, r) intermediate — far fewer VPU mults
    # than scaling the (tm, tn) output, numerically identical.
    xa = (xa * scale).astype(b_ref.dtype)
    o_ref[...] = jnp.dot(xa, b_ref[...],
                         preferred_element_type=jnp.float32).astype(o_ref.dtype)


def lora_forward(x, A, B, *, alpha, r, tm=256, tn=512, compute_dtype=None):
    """x: (..., dim) -> (..., dim_out); matches torch Lora.forward.

    tm / tn are tuning knobs (row tile, output-column tile). Defaults fit the
    64 MiB VMEM of v7x as well as v5e/v6e for typical LoRA shapes; re-derive the
    tile budget per generation for very large dim / dim_out.
    compute_dtype=jnp.bfloat16 halves HBM traffic for x/A/B (f32 accumulation).
    """
    scale = alpha / r
    orig_shape = x.shape
    out_dtype = x.dtype
    dim = x.shape[-1]
    rank = A.shape[-1]
    dim_out = B.shape[-1]

    if compute_dtype is not None:
        x = x.astype(compute_dtype)
        A = A.astype(compute_dtype)
        B = B.astype(compute_dtype)

    x2d = x.reshape(-1, dim)
    M = x2d.shape[0]

    # Clamp tiles so small problems don't over-pad; keep (8, 128) layout legality.
    tm = min(tm, _round_up(M, 8))
    tn = min(tn, _round_up(dim_out, 128))

    Mp = _round_up(M, tm)
    Np = _round_up(dim_out, tn)

    if Mp != M:
        x2d = jnp.pad(x2d, ((0, Mp - M), (0, 0)))
    Bp = B if Np == dim_out else jnp.pad(B, ((0, 0), (0, Np - dim_out)))

    grid = (Mp // tm, Np // tn)

    # VMEM budget: double-buffered x / B / out tiles + resident A, plus headroom.
    x_isz = x2d.dtype.itemsize
    vmem_bytes = (2 * tm * dim * x_isz
                  + 2 * rank * tn * Bp.dtype.itemsize
                  + 2 * tm * tn * out_dtype.itemsize
                  + dim * rank * A.dtype.itemsize)
    vmem_limit = int(min(2 * vmem_bytes + (16 << 20), 64 << 20))

    cost = pl.CostEstimate(
        flops=2 * Mp * rank * (dim + Np),
        transcendentals=0,
        bytes_accessed=(x2d.size * x_isz
                        + A.size * A.dtype.itemsize
                        + Bp.size * Bp.dtype.itemsize
                        + Mp * Np * out_dtype.itemsize),
    )

    out2d = pl.pallas_call(
        functools.partial(_lora_kernel, scale=scale),
        out_shape=jax.ShapeDtypeStruct((Mp, Np), out_dtype),
        grid_spec=pltpu.PrefetchScalarGridSpec(
            num_scalar_prefetch=0,
            grid=grid,
            in_specs=[
                pl.BlockSpec((tm, dim), lambda i, j: (i, 0)),        # x rows (pipelined)
                pl.BlockSpec(memory_space=pltpu.MemorySpace.VMEM),   # A fully resident
                pl.BlockSpec((rank, tn), lambda i, j: (0, j)),       # B column tile
            ],
            out_specs=pl.BlockSpec((tm, tn), lambda i, j: (i, j)),
        ),
        compiler_params=pltpu.CompilerParams(
            dimension_semantics=("parallel", "parallel"),
            vmem_limit_bytes=vmem_limit,
        ),
        cost_estimate=cost,
    )(x2d, A, Bp)

    out2d = out2d[:M, :dim_out]
    return out2d.reshape(*orig_shape[:-1], dim_out)


if __name__ == "__main__":
    # Small shapes consistent with the module: batch=2, seq=8, dim=32, dim_out=32, r=8.
    batch, seq, dim, dim_out, r = 2, 8, 32, 32, 8
    alpha = 16.0

    key = jax.random.PRNGKey(0)
    kx, ka, kb = jax.random.split(key, 3)

    x = jax.random.normal(kx, (batch, seq, dim), dtype=jnp.float32)
    A = jax.random.normal(ka, (dim, r), dtype=jnp.float32)
    B = jax.random.normal(kb, (r, dim_out), dtype=jnp.float32)

    # Reference (pure JAX, same math as the torch module).
    ref = x @ ((A @ B) * (alpha / r))

    # f32 path.
    out = lora_forward(x, A, B, alpha=alpha, r=r)
    out = jax.block_until_ready(out)
    assert out.shape == (batch, seq, dim_out)
    assert jnp.allclose(out, ref, atol=1e-3, rtol=1e-3)

    # bf16-operand path (f32 accumulation) — bandwidth-optimized variant.
    out_bf16 = lora_forward(x, A, B, alpha=alpha, r=r, compute_dtype=jnp.bfloat16)
    out_bf16 = jax.block_until_ready(out_bf16).astype(jnp.float32)
    rel_err = jnp.max(jnp.abs(out_bf16 - ref)) / (jnp.max(jnp.abs(ref)) + 1e-6)
    assert rel_err < 5e-2

    print("KERNEL_OK")
</pallas_src>

<mosaic_0001>
module attributes {stable_mosaic.version = 11 : i64} {
  func.func @_lora_kernel(%arg0: i32, %arg1: i32, %arg2: memref<16x32xf32, #tpu.memory_space<vmem>>, %arg3: memref<32x8xf32, #tpu.memory_space<vmem>>, %arg4: memref<8x128xf32, #tpu.memory_space<vmem>>, %arg5: memref<16x128xf32, #tpu.memory_space<vmem>>) attributes {dimension_semantics = [#tpu.dimension_semantics<parallel>, #tpu.dimension_semantics<parallel>], iteration_bounds = array<i64: 1, 1>, scalar_prefetch = 0 : i64, scratch_operands = 0 : i64, tpu.core_type = #tpu.core_type<tc>, window_params = [{transform_indices = @transform_0, window_bounds = array<i64: 16, 32>}, {pipeline_mode = #tpu.pipeline_mode<synchronous>, transform_indices = @transform_1, window_bounds = array<i64: 32, 8>}, {transform_indices = @transform_2, window_bounds = array<i64: 8, 128>}, {transform_indices = @transform_3, window_bounds = array<i64: 16, 128>}]} {
    %c0 = arith.constant 0 : index
    %c0_0 = arith.constant 0 : index
    %0 = vector.load %arg2[%c0, %c0_0] : memref<16x32xf32, #tpu.memory_space<vmem>>, vector<16x32xf32>
    %c0_1 = arith.constant 0 : index
    %c0_2 = arith.constant 0 : index
    %1 = vector.load %arg3[%c0_1, %c0_2] : memref<32x8xf32, #tpu.memory_space<vmem>>, vector<32x8xf32>
    %cst = arith.constant dense<0.000000e+00> : vector<16x8xf32>
    %2 = tpu.matmul %0, %1, %cst {dimension_numbers = #tpu.dot_dimension_numbers<[1], [0], [0], [1], [0, 0, 1, 1], [], []>} : vector<16x32xf32>, vector<32x8xf32>, vector<16x8xf32> -> vector<16x8xf32>
    %cst_3 = arith.constant 2.000000e+00 : f32
    %3 = vector.broadcast %cst_3 : f32 to vector<16x8xf32>
    %4 = arith.mulf %2, %3 : vector<16x8xf32>
    %c0_4 = arith.constant 0 : index
    %c0_5 = arith.constant 0 : index
    %5 = vector.load %arg4[%c0_4, %c0_5] : memref<8x128xf32, #tpu.memory_space<vmem>>, vector<8x128xf32>
    %cst_6 = arith.constant dense<0.000000e+00> : vector<16x128xf32>
    %6 = tpu.matmul %4, %5, %cst_6 {dimension_numbers = #tpu.dot_dimension_numbers<[1], [0], [0], [1], [0, 0, 1, 1], [], []>} : vector<16x8xf32>, vector<8x128xf32>, vector<16x128xf32> -> vector<16x128xf32>
    %c0_7 = arith.constant 0 : index
    %c0_8 = arith.constant 0 : index
    %7 = vector.load %arg5[%c0_7, %c0_8] : memref<16x128xf32, #tpu.memory_space<vmem>>, vector<16x128xf32>
    tpu.vector_store %arg5[%c0_7, %c0_8], %6 {strides = array<i32>} : memref<16x128xf32, #tpu.memory_space<vmem>>, vector<16x128xf32>,
    return
  }
  func.func @transform_0(%arg0: i32, %arg1: i32) -> (i32, i32) {
    %c0_i32 = arith.constant 0 : i32
    %c0_i32_0 = arith.constant 0 : i32
    return %arg0, %c0_i32 : i32, i32
  }
  func.func @transform_1(%arg0: i32, %arg1: i32) -> (i32, i32) {
    %c0_i32 = arith.constant 0 : i32
    %c0_i32_0 = arith.constant 0 : i32
    %c0_i32_1 = arith.constant 0 : i32
    return %c0_i32, %c0_i32_0 : i32, i32
  }
  func.func @transform_2(%arg0: i32, %arg1: i32) -> (i32, i32) {
    %c0_i32 = arith.constant 0 : i32
    %c0_i32_0 = arith.constant 0 : i32
    return %c0_i32, %arg1 : i32, i32
  }
  func.func @transform_3(%arg0: i32, %arg1: i32) -> (i32, i32) {
    %c0_i32 = arith.constant 0 : i32
    return %arg0, %arg1 : i32, i32
  }
}

</mosaic_0001>

<bundles_post_ra>
// kernel: tpu_custom_call.1
= control target key start
LH: loop header
LB: loop body
LE: loop exit
PB: predicated region body
PF: predicated region fallthrough
CT: control target
= control target key end

     0   :  { %vm21_vm0 = vcmask 261120   ;;  %s307_s0 = inlined_call_operand.vmem [shape: f32[16,32], index: 0, kind: input, shape index: {}]   ;;  %s308_s1 = inlined_call_operand.vmem [shape: f32[32,8], index: 1, kind: input, shape index: {}]   ;;  %s309_s2 = inlined_call_operand.vmem [shape: f32[8,128], index: 2, kind: input, shape index: {}]   ;;  %s310_s3 = inlined_call_operand.hbm [shape: f32[16,128], index: 3, kind: output, shape index: {}]  }
   0x1   :  { %v20_v0 = vld [vmem:[%s308_s1 + $0x18] sm:$0xff]  ;;  %v19_v1 = vld [vmem:[%s308_s1 + $0x10] sm:$0xff]  ;;  %v15_v2 = vld [vmem:[%s307_s0] sm:$0xff] }
   0x2   :  { %219 = vmatprep.subr.mxu0 %v20_v0  ;;  %v18_v3 = vld [vmem:[%s308_s1 + $0x8] sm:$0xff]  ;;  %227 = vmatprep.mubr.msk.f32.mxu0 %vm21_vm0, %v15_v2 }
   0x3   :  { %220 = vmatpush3.msra.mxu0 %v20_v0 }
   0x4   :  { %8 = vsyncpa [#allocation3], 0  ;;  %221 = vmatprep.subr.mxu0 %v19_v1  ;;  %v17_v4 = vld [vmem:[%s308_s1] sm:$0xff]  ;;  %v16_v5 = vld [vmem:[%s307_s0 + $0x8] sm:$0xff]  ;;  %vm106_vm1 = vcmask 64512   ;;  %s260_s1 = smov [#allocation2]  }
   0x5   :  { %222 = vmatpush3.msra.mxu0 %v19_v1  ;;  %v105_v6 = vld [vmem:[%s309_s2] sm:$0xff]  ;;  %s195_s26 = sshll.u32 %s260_s1, 4  ;;  %s196_s26 = int_to_ptr.vmem [resolvable:$true] %s195_s26 }
   0x6   :  { %223 = vmatprep.subr.mxu0 %v18_v3  ;;  %230 = vmatprep.subr.mxu1 %v105_v6  ;;  %s238_s0 = scalar_lea.vmem %s196_s26, 256  ;;  %p243_p1 = scmp.lt.s32.totalorder %s196_s26, %s196_s26 }
   0x7   :  { %224 = vmatpush3.msra.mxu0 %v18_v3  ;;  %231 = vmatpush3.msra.mxu1 %v105_v6  ;;  %p239_p0 = scmp.ne.s32.totalorder %s196_s26, %s238_s0  ;;  %p244_p2 = scmp.lt.s32.totalorder %s238_s0, %s238_s0 }
   0x8   :  { %225 = vmatprep.subr.mxu0 %v17_v4 }
   0x9   :  { %226 = vmatpush3.msra.mxu0 %v17_v4  ;;  %p245_p3 = por %p244_p2, %p243_p1 }
   0xa   :  { %228 = vmatmul.mubr.msk.f32.vlgmr.msra.gmra.mxu0 %vm21_vm0, %v16_v5 }
   0xb   :  { %p246_p4 = pnand %p245_p3, %p239_p0 }
  0xca   :  { %v229_v7 = vpop.f32.mrf.mxu0 }
  0xcb   :  { %v104_v10 = vmul.f32 2.0, %v229_v7 }
  0xcc   :  { %v94_v8 = vpop.f32.mrf.mxu0 }
  0xcd   :  { %v103_v9 = vmul.f32 2.0, %v94_v8 }
  0xcf   :  { %232 = vmatprep.mubr.msk.f32.mxu1 %vm106_vm1, %v103_v9 }
  0xd0   :  { %233 = vmatmul.mubr.msk.f32.vlgmr.msra.gmra.mxu1 %vm106_vm1, %v104_v10 }
 0x190   :  { %v234_v11 = vpop.f32.mrf.mxu1 }
 0x191   :  { %189 = vst [vmem:[#allocation2 + $0x8] sm:$0xff] %v234_v11 }
 0x192   :  { %v179_v12 = vpop.f32.mrf.mxu1 }
 0x193   :  { %188 = vst [vmem:[#allocation2] sm:$0xff] %v179_v12 }
 0x194   :  { %249 = shalt.err (!%p246_p4)
}
 0x195   :  { %s261_s2 = smov 128   ;;  %s262_s27 = smov 8  }
 0x196   :  { %201 = dma.vmem_to_hbm [thread:$0]  %s196_s26, 256, %s310_s3, [#allocation3], %s261_s2, %s261_s2, %s262_s27  }
 0x197   :  { %258 = dma.done.wait [#allocation3], 256  }
 0x198   :  { %259 = vsyncadd [#allocation3], 4294967040 }
 0x199   :  { %205 = vsyncpa [#allocation3], 1 }

</bundles_post_ra>
